<compile_context>
chip_gen: v7x
topology: tpu7x:2x2x1
jax: 0.10.0
libtpu: 0.0.40
codegen_flags: <defaults>
</compile_context>

<pallas_src>
import functools

import jax
import jax.numpy as jnp
from jax.experimental import pallas as pl
from jax.experimental.pallas import tpu as pltpu


def _round_up(x, m):
    return (x + m - 1) // m * m


def _pick_block(requested, n, sub):
    """Block size <= data extent, rounded to the dtype sublane multiple and,
    when large enough, to an MXU-native multiple of 128."""
    limit = _round_up(n, sub)                   # never tile beyond the data
    b = _round_up(min(requested, limit), sub)
    if b >= 128:
        b = min(_round_up(b, 128), limit)       # limit is itself a sub-multiple
    return b


def _siglip_loss_kernel(neg_scale_ref, neg_bias_ref, img_ref, txt_ref, out_ref):
    j = pl.program_id(1)                        # text-row block (reduction axis)

    # output block is resident across the j (reduction) axis: init at j == 0.
    @pl.when(j == 0)
    def _init():
        out_ref[...] = jnp.zeros_like(out_ref)

    # (bm, bn) block of pairwise similarities: contract the feature dim of both
    # operands directly (no in-kernel transpose), f32 accumulation on the MXU.
    dots = jax.lax.dot_general(
        img_ref[...], txt_ref[...],
        dimension_numbers=(((1,), (1,)), ((), ())),
        preferred_element_type=jnp.float32)

    # z = -(logit_scale * dots + logit_bias); the negation is folded into the
    # SMEM scalars so this is a single fused multiply-add per element.  Every
    # cell is treated as a negative pair; the diagonal is corrected exactly in
    # the wrapper via logsigmoid(x) = logsigmoid(-x) + x.
    z = neg_scale_ref[0, 0] * dots + neg_bias_ref[0, 0]

    # numerically-stable log-sigmoid: min(z, 0) - log1p(exp(-|z|))
    logsig = jnp.minimum(z, 0.0) - jnp.log1p(jnp.exp(-jnp.abs(z)))

    # lane-dense per-column partial sums, accumulated into the resident block.
    out_ref[...] += jnp.sum(logsig, axis=0, keepdims=True)[None]


def siglip_loss(image_features, text_features, logit_scale, logit_bias,
                *, block_m=1024, block_n=512, downcast_to_bf16=True):
    """Scalar SigLIP loss (float32)."""
    n, d = image_features.shape
    assert text_features.shape == (n, d)
    assert image_features.dtype == text_features.dtype

    # feature dtype: bf16 is MXU-native on every TPU generation; keep the
    # caller's dtype if it is already sub-f32 or if downcasting is disabled.
    if downcast_to_bf16 and image_features.dtype == jnp.float32:
        feat_dtype = jnp.bfloat16
    else:
        feat_dtype = image_features.dtype
    img = image_features.astype(feat_dtype)
    txt = text_features.astype(feat_dtype)

    itemsize = jnp.dtype(feat_dtype).itemsize
    sub = {4: 8, 2: 16, 1: 32}[itemsize]        # dtype-native sublane multiple

    # lane-align the feature dim; zero-padding contributes nothing to the dots.
    d_pad = _round_up(d, 128)

    bm = _pick_block(block_m, n, sub)
    bn = _pick_block(block_n, n, sub)

    # v7x shards the "parallel" i axis across its 2 TensorCores: make sure
    # there are at least 2 row blocks whenever the problem is big enough to
    # split into two >=128-row blocks (otherwise one TC sits idle).
    n_rows = _round_up(n, sub)
    if bm >= n_rows and n_rows >= 256:
        bm = _round_up(-(-n_rows // 2), sub)

    nm = _round_up(n, bm)                       # padded image rows
    nt = _round_up(n, bn)                       # padded text rows
    gm, gn = nm // bm, nt // bn

    img_p = jnp.pad(img, ((0, nm - n), (0, d_pad - d)))
    txt_p = jnp.pad(txt, ((0, nt - n), (0, d_pad - d)))

    scale = jnp.asarray(logit_scale, jnp.float32)
    bias = jnp.asarray(logit_bias, jnp.float32)
    neg_scale = (-scale).reshape(1, 1)
    neg_bias = (-bias).reshape(1, 1)

    # scoped-VMEM hint from the actual block footprint; capped at 48 MiB so it
    # never claims all of a v7x TensorCore's 64 MiB (leave pipelining headroom).
    block_bytes = (2 * bm * d_pad * itemsize      # double-buffered image block
                   + 2 * bn * d_pad * itemsize    # double-buffered text block
                   + 4 * bm * bn * 4              # f32 dots/z/logsig temporaries
                   + 2 * bn * 4)                  # resident output block
    vmem_limit = min(48 * 1024 * 1024,
                     max(32 * 1024 * 1024, block_bytes * 5 // 4))

    cost = pl.CostEstimate(
        flops=2 * nm * nt * d_pad + 6 * nm * nt,
        transcendentals=2 * nm * nt,
        bytes_accessed=(nm * d_pad * itemsize           # image rows: one pass
                        + gm * nt * d_pad * itemsize    # text rows: one pass / row block
                        + gm * bn * 4 + 8))

    partial_sums = pl.pallas_call(
        _siglip_loss_kernel,
        out_shape=jax.ShapeDtypeStruct((gm, 1, bn), jnp.float32),
        grid_spec=pltpu.PrefetchScalarGridSpec(
            num_scalar_prefetch=0,
            grid=(gm, gn),
            in_specs=[
                pl.BlockSpec(memory_space=pltpu.MemorySpace.SMEM),   # -scale
                pl.BlockSpec(memory_space=pltpu.MemorySpace.SMEM),   # -bias
                pl.BlockSpec((bm, d_pad), lambda i, j: (i, 0)),      # img rows
                pl.BlockSpec((bn, d_pad), lambda i, j: (j, 0)),      # txt rows
            ],
            out_specs=pl.BlockSpec((1, 1, bn), lambda i, j: (i, 0, 0)),
        ),
        compiler_params=pltpu.CompilerParams(
            dimension_semantics=("parallel", "arbitrary"),
            vmem_limit_bytes=vmem_limit),
        cost_estimate=cost,
    )(neg_scale, neg_bias, img_p, txt_p)

    raw_sum = jnp.sum(partial_sums)             # sum over nm x nt of logsigmoid(-logits)

    # Analytic padding correction: padded rows/cols have exactly-zero features,
    # so every padded cell's logits == logit_bias -> logsigmoid(-logit_bias).
    num_pad = nm * nt - n * n
    pad_correction = jnp.float32(num_pad) * jax.nn.log_sigmoid(-bias)

    # Exact diagonal correction via logsigmoid(x) = logsigmoid(-x) + x:
    #   sum_i logits_ii = logit_scale * sum_i <img_i, txt_i> + n * logit_bias
    # computed in f32 from the original features (cheap O(N*d) XLA op).
    diag = jnp.sum(image_features.astype(jnp.float32)
                   * text_features.astype(jnp.float32), axis=-1)
    trace_correction = scale * jnp.sum(diag) + jnp.float32(n) * bias

    total = raw_sum - pad_correction + trace_correction
    return -total / jnp.float32(n)


def _reference_loss(image_features, text_features, logit_scale, logit_bias):
    x = image_features.astype(jnp.float32)
    y = text_features.astype(jnp.float32)
    n = x.shape[0]
    logits = logit_scale * x @ y.T + logit_bias
    labels = 2.0 * jnp.eye(n, dtype=jnp.float32) - 1.0
    return -jnp.sum(jax.nn.log_sigmoid(labels * logits)) / n


if __name__ == "__main__":
    key = jax.random.PRNGKey(0)
    k1, k2, k3, k4 = jax.random.split(key, 4)

    def make(ki, kt, n, d, dtype):
        img = jax.random.normal(ki, (n, d), dtype=jnp.float32)
        txt = jax.random.normal(kt, (n, d), dtype=jnp.float32)
        img = img / jnp.linalg.norm(img, axis=-1, keepdims=True)
        txt = txt / jnp.linalg.norm(txt, axis=-1, keepdims=True)
        return img.astype(dtype), txt.astype(dtype)

    logit_scale = jnp.float32(10.0)   # SigLIP init: exp(log(10))
    logit_bias = jnp.float32(-10.0)

    # 1) multi-block 3x3 grid, pure-f32 path: exercises the j-axis accumulation,
    #    the parallel i axis and the uniform (branch-free) epilogue.
    img, txt = make(k1, k2, 48, 128, jnp.float32)
    out = jax.block_until_ready(
        siglip_loss(img, txt, logit_scale, logit_bias,
                    block_m=16, block_n=16, downcast_to_bf16=False))
    ref = _reference_loss(img, txt, logit_scale, logit_bias)
    assert jnp.allclose(out, ref, rtol=1e-4, atol=1e-4), (out, ref)

    # 2) ragged N / D (13, 96) with the default bf16 downcast: exercises the
    #    analytic padding correction and the 16-row bf16 tiling.
    img, txt = make(k3, k4, 13, 96, jnp.float32)
    out = jax.block_until_ready(siglip_loss(img, txt, logit_scale, logit_bias))
    ref = _reference_loss(img, txt, logit_scale, logit_bias)
    assert jnp.allclose(out, ref, rtol=2e-2, atol=2e-2), (out, ref)

    # 3) native bf16 features, default block sizes: exercises the forced >=2
    #    row-block split of the parallel axis (gm=2) with a resident txt block.
    img, txt = make(k1, k3, 256, 128, jnp.bfloat16)
    out = jax.block_until_ready(siglip_loss(img, txt, logit_scale, logit_bias))
    ref = _reference_loss(img, txt, logit_scale, logit_bias)
    assert jnp.allclose(out, ref, rtol=2e-2, atol=2e-2), (out, ref)

    print("KERNEL_OK")
</pallas_src>

<mosaic_0001>
module attributes {stable_mosaic.version = 11 : i64} {
  func.func @_siglip_loss_kernel(%arg0: i32, %arg1: i32, %arg2: memref<1x1xf32, #tpu.memory_space<smem>>, %arg3: memref<1x1xf32, #tpu.memory_space<smem>>, %arg4: memref<16x128xf32, #tpu.memory_space<vmem>>, %arg5: memref<16x128xf32, #tpu.memory_space<vmem>>, %arg6: memref<1x1x16xf32, #tpu.memory_space<vmem>>) attributes {dimension_semantics = [#tpu.dimension_semantics<parallel>, #tpu.dimension_semantics<arbitrary>], iteration_bounds = array<i64: 3, 3>, scalar_prefetch = 0 : i64, scratch_operands = 0 : i64, tpu.core_type = #tpu.core_type<tc>, window_params = [{transform_indices = @transform_0, window_bounds = array<i64: 1, 1>}, {transform_indices = @transform_1, window_bounds = array<i64: 1, 1>}, {transform_indices = @transform_2, window_bounds = array<i64: 16, 128>}, {transform_indices = @transform_3, window_bounds = array<i64: 16, 128>}, {transform_indices = @transform_4, window_bounds = array<i64: 1, 1, 16>}]} {
    %c0_i32 = arith.constant 0 : i32
    %0 = arith.cmpi eq, %arg1, %c0_i32 : i32
    %1 = arith.extui %0 : i1 to i32
    %c0_i32_0 = arith.constant 0 : i32
    %2 = arith.cmpi ne, %1, %c0_i32_0 : i32
    scf.if %2 {
      %cst_17 = arith.constant 0.000000e+00 : f32
      %26 = vector.broadcast %cst_17 : f32 to vector<1x1x16xf32>
      %c0_18 = arith.constant 0 : index
      %c0_19 = arith.constant 0 : index
      %c0_20 = arith.constant 0 : index
      %27 = vector.load %arg6[%c0_18, %c0_19, %c0_20] : memref<1x1x16xf32, #tpu.memory_space<vmem>>, vector<1x1x16xf32>
      tpu.vector_store %arg6[%c0_18, %c0_19, %c0_20], %26 {strides = array<i32>} : memref<1x1x16xf32, #tpu.memory_space<vmem>>, vector<1x1x16xf32>,
    } else {
    }
    %c0 = arith.constant 0 : index
    %c0_1 = arith.constant 0 : index
    %3 = vector.load %arg4[%c0, %c0_1] : memref<16x128xf32, #tpu.memory_space<vmem>>, vector<16x128xf32>
    %c0_2 = arith.constant 0 : index
    %c0_3 = arith.constant 0 : index
    %4 = vector.load %arg5[%c0_2, %c0_3] : memref<16x128xf32, #tpu.memory_space<vmem>>, vector<16x128xf32>
    %cst = arith.constant dense<0.000000e+00> : vector<16x16xf32>
    %5 = tpu.matmul %3, %4, %cst {dimension_numbers = #tpu.dot_dimension_numbers<[1], [1], [0], [0], [0, 0, 1, 0], [], []>} : vector<16x128xf32>, vector<16x128xf32>, vector<16x16xf32> -> vector<16x16xf32>
    %c0_4 = arith.constant 0 : index
    %c0_5 = arith.constant 0 : index
    %6 = memref.load %arg2[%c0_4, %c0_5] : memref<1x1xf32, #tpu.memory_space<smem>>
    %7 = vector.broadcast %6 : f32 to vector<16x16xf32>
    %8 = arith.mulf %7, %5 : vector<16x16xf32>
    %c0_6 = arith.constant 0 : index
    %c0_7 = arith.constant 0 : index
    %9 = memref.load %arg3[%c0_6, %c0_7] : memref<1x1xf32, #tpu.memory_space<smem>>
    %10 = vector.broadcast %9 : f32 to vector<16x16xf32>
    %11 = arith.addf %8, %10 : vector<16x16xf32>
    %cst_8 = arith.constant 0.000000e+00 : f32
    %12 = vector.broadcast %cst_8 : f32 to vector<16x16xf32>
    %13 = arith.minimumf %11, %12 : vector<16x16xf32>
    %14 = math.absf %11 : vector<16x16xf32>
    %cst_9 = arith.constant 0.000000e+00 : f32
    %15 = vector.broadcast %cst_9 : f32 to vector<16x16xf32>
    %16 = arith.subf %15, %14 : vector<16x16xf32>
    %17 = math.exp %16 : vector<16x16xf32>
    %18 = math.log1p %17 : vector<16x16xf32>
    %19 = arith.subf %13, %18 : vector<16x16xf32>
    %c0_10 = arith.constant 0 : index
    %c0_11 = arith.constant 0 : index
    %c0_12 = arith.constant 0 : index
    %20 = vector.load %arg6[%c0_10, %c0_11, %c0_12] : memref<1x1x16xf32, #tpu.memory_space<vmem>>, vector<1x1x16xf32>
    %cst_13 = arith.constant dense<0.000000e+00> : vector<16xf32>
    %21 = vector.multi_reduction <add>, %19, %cst_13 [0] : vector<16x16xf32> to vector<16xf32>
    %22 = vector.shape_cast %21 : vector<16xf32> to vector<1x16xf32>
    %23 = vector.shape_cast %22 : vector<1x16xf32> to vector<1x1x16xf32>
    %24 = arith.addf %20, %23 : vector<1x1x16xf32>
    %c0_14 = arith.constant 0 : index
    %c0_15 = arith.constant 0 : index
    %c0_16 = arith.constant 0 : index
    %25 = vector.load %arg6[%c0_14, %c0_15, %c0_16] : memref<1x1x16xf32, #tpu.memory_space<vmem>>, vector<1x1x16xf32>
    tpu.vector_store %arg6[%c0_14, %c0_15, %c0_16], %24 {strides = array<i32>} : memref<1x1x16xf32, #tpu.memory_space<vmem>>, vector<1x1x16xf32>,
    return
  }
  func.func @transform_0(%arg0: i32, %arg1: i32) -> (i32, i32) {
    %c0_i32 = arith.constant 0 : i32
    %c0_i32_0 = arith.constant 0 : i32
    %c0_i32_1 = arith.constant 0 : i32
    return %c0_i32, %c0_i32_0 : i32, i32
  }
  func.func @transform_1(%arg0: i32, %arg1: i32) -> (i32, i32) {
    %c0_i32 = arith.constant 0 : i32
    %c0_i32_0 = arith.constant 0 : i32
    %c0_i32_1 = arith.constant 0 : i32
    return %c0_i32, %c0_i32_0 : i32, i32
  }
  func.func @transform_2(%arg0: i32, %arg1: i32) -> (i32, i32) {
    %c0_i32 = arith.constant 0 : i32
    %c0_i32_0 = arith.constant 0 : i32
    return %arg0, %c0_i32 : i32, i32
  }
  func.func @transform_3(%arg0: i32, %arg1: i32) -> (i32, i32) {
    %c0_i32 = arith.constant 0 : i32
    %c0_i32_0 = arith.constant 0 : i32
    return %arg1, %c0_i32 : i32, i32
  }
  func.func @transform_4(%arg0: i32, %arg1: i32) -> (i32, i32, i32) {
    %c0_i32 = arith.constant 0 : i32
    %c0_i32_0 = arith.constant 0 : i32
    %c0_i32_1 = arith.constant 0 : i32
    return %arg0, %c0_i32, %c0_i32_0 : i32, i32, i32
  }
}

</mosaic_0001>

<bundles_post_ra>
// kernel: tpu_custom_call.1
= control target key start
LH: loop header
LB: loop body
LE: loop exit
PB: predicated region body
PF: predicated region fallthrough
CT: control target
= control target key end

     0   :  { %s1217_s0 = inlined_call_operand.<no memory space> [shape: f32[1,1], index: 0, kind: input, shape index: {}]   ;;  %s1218_s1 = inlined_call_operand.<no memory space> [shape: f32[1,1], index: 1, kind: input, shape index: {}]   ;;  %s1219_s2 = inlined_call_operand.hbm [shape: f32[48,128], index: 2, kind: input, shape index: {}]   ;;  %s1220_s3 = inlined_call_operand.hbm [shape: f32[48,128], index: 3, kind: input, shape index: {}]   ;;  %s1221_s4 = inlined_call_operand.hbm [shape: f32[3,1,16], index: 4, kind: output, shape index: {}]  }
   0x1   :  { %1231 = sst [smem:[#allocation15_spill]] %s1219_s2 }
   0x2   :  { %9 = sst [smem:[#allocation2]] %s1217_s0 }
   0x3   :  { %10 = sst [smem:[#allocation3]] %s1218_s1 }
   0x4   :  { %11 = vsyncpa [#allocation5], 0 }
   0x5   :  { %13 = vsyncpa [#allocation5 + $0x1], 0 }
   0x6   :  { %14 = vsyncpa [#allocation8], 0 }
   0x7   :  { %16 = vsyncpa [#allocation8 + $0x1], 0 }
   0x8   :  { %17 = vsyncpa [#allocation6], 0 }
   0x9   :  { %19 = vsyncpa [#allocation6 + $0x1], 0  ;;  %s898_s19 = smov 0   ;;  %s900_s20 = smov 0  }
   0xa   :  { %s902_s21 = smov 0   ;;  %s904_s22 = smov 0  }
   0xb   :  { %s906_s23 = smov 0   ;;  %s908_s0 = smov 0  }
   0xc   :  { %s910_s24 = smov 0   ;;  %s912_s1 = smov 0  }
   0xd   :  { %s914_s25 = smov 0   ;;  %s916_s26 = smov 0  }
   0xe   :  { %s918_s27 = smov 0  }
   0xf LB: > { %s521_s28 = sadd.s32 4294967295, %s859_s27   ;;  %s522_s29 = sadd.s32 4294967294, %s859_s27   ;;  %s859_s27 = sphi %s918_s27, %s25_s27   ;;  %s855_s26 = sphi %s916_s26, %s1264_s26   ;;  %s851_s25 = sphi %s914_s25, %s1263_s25   ;;  %s847_s1 = sphi %s912_s1, %s1262_s1   ;;  %s843_s24 = sphi %s910_s24, %s1261_s24   ;;  %s839_s0 = sphi %s908_s0, %s1260_s0   ;;  %s835_s23 = sphi %s906_s23, %s1259_s23   ;;  %s831_s22 = sphi %s904_s22, %s1258_s22   ;;  %s827_s21 = sphi %s902_s21, %s1257_s21   ;;  %s823_s20 = sphi %s900_s20, %s1256_s20   ;;  %s819_s19 = sphi %s898_s19, %s1255_s19  }
  0x10   : > { %s37_s30 = sadd.s32 1, %s855_s26  ;;  %s86_s5 = sadd.s32 1, %s839_s0 }
  0x11   : > { %p93_p0 = scmp.ne.s32.totalorder %s839_s0, %s835_s23  ;;  %p1223_p1 = scmp.eq.s32.totalorder %s859_s27, 0 }
  0x12   : > { %p99_p2 = scmp.ne.s32.totalorder %s835_s23, %s831_s22  ;;  %p962_p3 = scmp.eq.s32.totalorder %s521_s28, 0 }
  0x13   : > { %p968_p4 = por %p1223_p1, %p93_p0  ;;  %p149_p5 = scmp.eq.s32.totalorder %s521_s28, 8 }
  0x14   : > { %p974_p6 = por %p962_p3, %p99_p2  ;;  %p155_p7 = scmp.eq.s32.totalorder %s522_s29, 8 }
  0x15   : > { %p978_p8 = por %p149_p5, %p93_p0  ;;  %p1222_p10 = scmp.lt.s32.totalorder %s859_s27, 9 }
  0x16   : > { %s1234_s8 = scalar_select %p974_p6, 1, 0 }
  0x17   : > { %s1235_s9 = scalar_select %p978_p8, 1, 0 }
  0x18   : > { %p982_p9 = por %p155_p7, %p99_p2  ;;  %s181_s11 = sand.u32 1, %s839_s0  }
  0x19   : > { %s538_s12 = sshll.u32 %s855_s26, 8  ;;  %s525_s13 = sshll.u32 %s181_s11, 4 }
  0x1a   : > { %s1236_s10 = scalar_select %p982_p9, 1, 0 }
  0x1b   : > { %s1238_s2 = sld [smem:[#allocation15_spill]]  ;;  %s185_s17 = scalar_lea.vmem [#allocation4], %s525_s13 }
  0x1c   : > { %1237 = sst [smem:[#allocation13_spill]] %s1236_s10  ;;  %s192_s18 = sshll.u32 %s185_s17, 4  ;;  %s1002_s18 = int_to_ptr.vmem [resolvable:$true] %s192_s18 }
  0x1d   : > { %p998_p11 = pnand %p1222_p10, %p968_p4  ;;  %s1004_s29 = scalar_lea.sflag [#allocation5], %s181_s11 }
  0x1f   : > { %p675_p13 = pneg %p998_p11 }
  0x21   : > { %s992_s16 = scalar_lea.hbm %s1238_s2, %s538_s12  ;;  %s678_s14 = scalar_lea.hbm %s1238_s2, 768 }
  0x22   : > { %s673_s12 = scalar_lea.hbm %s992_s16, 256  ;;  %p679_p4 = scmp.lt.u32.totalorder %s992_s16, %s1238_s2 }
  0x23   : > { %p674_p12 = scmp.ne.s32.totalorder %s992_s16, %s673_s12  ;;  %p680_p5 = scmp.lt.u32.totalorder %s678_s14, %s673_s12 }
  0x24   : > { %p682_p10 = scmp.lt.u32.totalorder %s673_s12, %s992_s16 }
  0x25   : > { %p676_p0 = pnand %p675_p13, %p674_p12  ;;  %p681_p7 = por %p680_p5, %p679_p4 }
  0x27   : > { %p677_p2 = pneg %p676_p0  ;;  %p683_p1 = por %p682_p10, %p681_p7 }
  0x29   : > { %p684_p9 = pnand %p683_p1, %p677_p2 }
  0x2b   : > { %687 = shalt.err (!%p684_p9)
}
  0x2c   : > { %s688_s11 = scalar_lea.vmem %s1002_s18, 256  ;;  %s861_s7 = smov [#allocation4]  }
  0x2d   : > { %p689_p12 = scmp.ne.s32.totalorder %s1002_s18, %s688_s11  ;;  %s693_s13 = sshll.u32 %s861_s7, 4  ;;  %s694_s13 = int_to_ptr.vmem [resolvable:$false] %s693_s13 }
  0x2e   : > { %s695_s15 = scalar_lea.vmem %s694_s13, 512  ;;  %p696_p6 = scmp.lt.s32.totalorder %s1002_s18, %s694_s13 }
  0x2f   : > { %p691_p0 = pnand %p689_p12, %p675_p13  ;;  %p697_p4 = scmp.lt.s32.totalorder %s695_s15, %s688_s11 }
  0x31   : > { %p692_p8 = pneg %p691_p0  ;;  %p698_p5 = por %p697_p4, %p696_p6 }
  0x33   : > { %p699_p10 = pnand %p698_p5, %p692_p8 }
  0x35   : > { %702 = shalt.err (!%p699_p10)
}
  0x36   : > { %s1226_s12 = smov 128   ;;  %s1227_s14 = smov 8  }
  0x37   : > { %564 = dma.hbm_to_vmem [thread:$0]  (!%p998_p11), %s992_s16, 256, %s1002_s18, %s1004_s29, %s1226_s12, %s1226_s12, %s1227_s14  }
  0x38   : > { %p531_p1 = scmp.ge.s32.totalorder %s859_s27, 1  ;;  %p221_p6 = scmp.lt.s32.totalorder %s859_s27, 10 }
  0x39   : > { %s34_s11 = sadd.s32 1, %s851_s25  ;;  %s112_s7 = sadd.s32 1, %s827_s21 }
  0x3a   : > { %p1037_p8 = pnand %p531_p1, %p221_p6  ;;  %p35_p9 = scmp.ge.s32.totalorder %s34_s11, 3 }
  0x3b   : > { %p119_p13 = scmp.ne.s32.totalorder %s827_s21, %s823_s20  ;;  %p125_p2 = scmp.ne.s32.totalorder %s823_s20, %s819_s19 }
  0x3c   : > { %s1266_s11 = smov (%p35_p9, %s34_s11), 0  ;;  %s1268_s30 = smov (!%p35_p9, %s37_s30), %s855_s26 }
  0x3d   : > { %1241 = sst [smem:[#allocation14_spill]] %s1266_s11  ;;  %s109_s16 = ssub.s32 %s851_s25, %s1266_s11 }
  0x3e   : > { %p1242_p11 = scmp.eq.s32.totalorder %s859_s27, 0  ;;  %p39_p12 = scmp.ge.s32.totalorder %s1268_s30, 3 }
  0x3f   : > { %p110_p0 = scmp.eq.s32.totalorder %s109_s16, 0  ;;  %p1062_p4 = por %p125_p2, %p962_p3 }
  0x40   : > { %p1056_p7 = por %p119_p13, %p1242_p11  ;;  %s202_s19 = sand.u32 1, %s827_s21  }
  0x41   : > { %s1244_s28 = scalar_select %p1062_p4, 1, 0 }
  0x42   : > { %s1270_s30 = smov (%p39_p12, %s1268_s30), 0  ;;  %s528_s15 = sshll.u32 %s202_s19, 4 }
  0x43   : > { %s1070_s29 = scalar_select %p110_p0, %s827_s21, %s112_s7  }
  0x44   : > { %s83_s13 = ssub.s32 %s855_s26, %s1270_s30  ;;  %s539_s12 = sshll.u32 %s851_s25, 8 }
  0x45   : > { %p84_p5 = scmp.eq.s32.totalorder %s83_s13, 0  ;;  %s1083_s6 = scalar_lea.hbm %s1220_s3, %s539_s12 }
  0x46   : > { %s206_s11 = scalar_lea.vmem [#allocation7], %s528_s15  ;;  %p1245_p3 = scmp.lt.s32.totalorder %s859_s27, 9 }
  0x47   : > { %s1078_s14 = scalar_select %p84_p5, %s839_s0, %s86_s5  }
  0x48   : > { %s213_s10 = sshll.u32 %s206_s11, 4  ;;  %p1091_p10 = pnand %p1245_p3, %p1056_p7  ;;  %s1085_s10 = int_to_ptr.vmem [resolvable:$true] %s213_s10 }
  0x49   : > { %s1095_s5 = scalar_lea.sflag [#allocation8], %s202_s19  ;;  %s703_s2 = scalar_lea.hbm %s1083_s6, 256 }
  0x4a   : > { %p704_p1 = scmp.ne.s32.totalorder %s1083_s6, %s703_s2  ;;  %p705_p6 = pneg %p1091_p10 }
  0x4b   : > { %s708_s18 = scalar_lea.hbm %s1220_s3, 768  ;;  %p709_p2 = scmp.lt.u32.totalorder %s1083_s6, %s1220_s3 }
  0x4c   : > { %p706_p9 = pnand %p705_p6, %p704_p1  ;;  %p710_p11 = scmp.lt.u32.totalorder %s708_s18, %s703_s2 }
  0x4d   : > { %p712_p12 = scmp.lt.u32.totalorder %s703_s2, %s1083_s6 }
  0x4e   : > { %p707_p13 = pneg %p706_p9  ;;  %p711_p7 = por %p710_p11, %p709_p2 }
  0x50   : > { %p713_p0 = por %p712_p12, %p711_p7 }
  0x52   : > { %p714_p5 = pnand %p713_p0, %p707_p13 }
  0x54   : > { %717 = shalt.err (!%p714_p5)
}
  0x55   : > { %s718_s19 = scalar_lea.vmem %s1085_s10, 256  ;;  %s864_s16 = smov [#allocation7]  }
  0x56   : > { %p719_p3 = scmp.ne.s32.totalorder %s1085_s10, %s718_s19  ;;  %s723_s12 = sshll.u32 %s864_s16, 4  ;;  %s724_s12 = int_to_ptr.vmem [resolvable:$false] %s723_s12 }
  0x57   : > { %s725_s11 = scalar_lea.vmem %s724_s12, 512  ;;  %p726_p4 = scmp.lt.s32.totalorder %s1085_s10, %s724_s12 }
  0x58   : > { %p721_p1 = pnand %p719_p3, %p705_p6  ;;  %p727_p2 = scmp.lt.s32.totalorder %s725_s11, %s718_s19 }
  0x5a   : > { %p722_p9 = pneg %p721_p1  ;;  %p728_p11 = por %p727_p2, %p726_p4 }
  0x5c   : > { %p729_p7 = pnand %p728_p11, %p722_p9 }
  0x5e   : > { %732 = shalt.err (!%p729_p7)
}
  0x5f   : > { %s1247_s2 = smov 8   ;;  %s1248_s18 = smov 128  }
  0x60   : > { %567 = dma.hbm_to_vmem [thread:$0]  (!%p1091_p10), %s1083_s6, 256, %s1085_s10, %s1095_s5, %s1248_s18, %s1248_s18, %s1247_s2  }
  0x61   : > { %225 = sbr.rel (%p1037_p8) target bundleno = 412 (0x19c), region = 36  ;;  %s1129_s13 = sand.u32 (!%p1037_p8), 1, %s835_s23  }
  0x62   : > { %s532_s15 = sshll.u32 (!%p1037_p8), %s1129_s13, 4  ;;  %s228_s19 = scalar_lea.sflag (!%p1037_p8), [#allocation5], %s1129_s13 }
  0x63   : > { %s231_s16 = scalar_lea.vmem (!%p1037_p8), [#allocation4], %s532_s15  ;;  %p1249_p4 = scmp.ne.s32.totalorder (!%p1037_p8), %s1234_s8, 0 }
  0x68   : > { %806 = dma.done.wait (%p1249_p4), %s228_s19, 256  }
  0x69   : > { %808 = vsyncadd (%p1249_p4), %s228_s19, 4294967040  ;;  %s236_s10 = sand.u32 1, %s823_s20   ;;  %p1250_p8 = scmp.ne.s32.totalorder %s1244_s28, 0 }
  0x6a   : > { %s533_s6 = sshll.u32 %s236_s10, 4  ;;  %s237_s17 = scalar_lea.sflag [#allocation8], %s236_s10 }
  0x6b   : > { %s240_s7 = scalar_lea.vmem [#allocation7], %s533_s6 }
  0x6c   : > { %810 = dma.done.wait (%p1250_p8), %s237_s17, 256  }
  0x6d   : > { %812 = vsyncadd (%p1250_p8), %s237_s17, 4294967040  ;;  %s1143_s5 = scalar_lea.vmem [#allocation9], %s1129_s13  ;;  %p534_p10 = scmp.ne.s32.totalorder %s843_s24, 0 }
  0x6e   : > { %vm275_vm0 = vcmask (!%p534_p10), 122880   ;;  %v865_v0 = vmov (!%p534_p10), 0.0  }
  0x6f   : > { %274 = sbr.rel (%p534_p10) target bundleno = 118 (0x76), region = 48  ;;  %276 = vst.msk [vmem:[%s1143_s5] sm:$0x1] (!%p534_p10), %vm275_vm0, %v865_v0 }
  0x76 PF: > { %v279_v1 = vld [vmem:[%s240_s7] sm:$0xff]  ;;  %v280_v2 = vld [vmem:[%s240_s7 + $0x8] sm:$0xff]  ;;  %s356_s8 = sld [smem:[#allocation2]]  ;;  %vm395_vm2 = vcmask 130048   ;;  %s535_s24 = sshll.u32 %s847_s1, 4  ;;  %vm406_vm4 = vcmask 122880  }
  0x77   : > { %v277_v3 = vld [vmem:[%s231_s16] sm:$0xff]  ;;  %v551_v4 = vpack.c.bf16 %v280_v2, %v279_v1  ;;  %v278_v5 = vld [vmem:[%s231_s16 + $0x8] sm:$0xff]  ;;  %s360_s28 = sld [smem:[#allocation3]]  ;;  %s421_s12 = sshll.u32 %s1143_s5, 4  ;;  %s1155_s12 = int_to_ptr.vmem [resolvable:$true] %s421_s12 }
  0x78   : > { %548 = vmatprep.mubr.f32.mxu0 %v277_v3  ;;  %v394_v50 = vld [vmem:[%s1143_s5] sm:$0x1]  ;;  %s1153_s18 = scalar_lea.hbm %s1221_s4, %s535_s24  ;;  %s409_s15 = scalar_lea.sflag [#allocation6], %s1129_s13 }
  0x79   : > { %552 = vmatprep.subr.bf16.mxu0 %v551_v4  ;;  %s733_s19 = scalar_lea.vmem %s1155_s12, 16  ;;  %p1251_p13 = scmp.ne.s32.totalorder %s1235_s9, 0 }
  0x7a   : > { %554 = vmatpush3.bf16.xpose.msra.mxu0 %v551_v4  ;;  %p734_p6 = scmp.ne.s32.totalorder %s1155_s12, %s733_s19  ;;  %s866_s1 = smov [#allocation9]  }
  0x7b   : > { %s737_s16 = sshll.u32 %s866_s1, 4  ;;  %s738_s16 = int_to_ptr.vmem [resolvable:$false] %s737_s16 }
  0x7c   : > { %v357_v6 = vstv %s356_s8  ;;  %p735_p12 = pnand %p734_p6, %p1251_p13  ;;  %s739_s10 = scalar_lea.vmem %s738_s16, 32 }
  0x7d   : > { %v361_v8 = vstv %s360_s28  ;;  %p740_p5 = scmp.lt.s32.totalorder %s1155_s12, %s738_s16  ;;  %p741_p3 = scmp.lt.s32.totalorder %s739_s10, %s733_s19 }
  0x7e   : > { %p736_p0 = pneg %p735_p12 }
  0x7f   : > { %p742_p1 = por %p741_p3, %p740_p5 }
  0x81   : > { %549 = vmatmul.mubr.f32.vlgmr.msra.gmra.mrb[0].mxu0 %v278_v5  ;;  %p743_p9 = pnand %p742_p1, %p736_p0 }
 0x154   : > { %v550_v7 = vpop.f32.mrb[0].mxu0 }
 0x155   : > { %v359_v9 = vmul.f32 %v550_v7, %v357_v6  ;;  %v347_v10 = vpop.f32.mrb[1].mxu0 }
 0x156   : > { %v358_v11 = vmul.f32 %v357_v6, %v347_v10 }
 0x157   : > { %v363_v12 = vadd.f32 %v361_v8, %v359_v9 }
 0x158   : > { %v362_v13 = vadd.f32 %v361_v8, %v358_v11 }
 0x159   : > { %v367_v14 = vand.u32 2147483647, %v363_v12  ;;  %v365_v34 = vmin.f32 %v363_v12, 0.0 }
 0x15a   : > { %v366_v15 = vand.u32 2147483647, %v362_v13  ;;  %v364_v38 = vmin.f32 %v362_v13, 0.0 }
 0x15b   : > { %v369_v16 = vsub.f32 0.0, %v367_v14 }
 0x15c   : > { %v368_v17 = vsub.f32 0.0, %v366_v15 }
 0x15d   : > { %v372_v18 = vmul.f32 1.442695, %v369_v16 }
 0x15e   : > { %v370_v19 = vmul.f32 1.442695, %v368_v17 }
 0x15f   : > { %665 = vpow2.f32 %v372_v18 }
 0x160   : > { %667 = vpow2.f32 %v370_v19 }
 0x169   : > { %v666_v20 = vpop.eup %665 }
 0x16a   : > { %v668_v21 = vpop.eup %667  ;;  %v383_v22 = vadd.f32 1.0, %v666_v20  ;;  %v386_v24 = vmul.f32 -0.5, %v666_v20  ;;  %v389_v27 = vand.u32 2147483647, %v666_v20 }
 0x16b   : > { %v374_v23 = vadd.f32 1.0, %v668_v21  ;;  %v377_v25 = vmul.f32 -0.5, %v668_v21  ;;  %v380_v29 = vand.u32 2147483647, %v668_v21 }
 0x16c   : > { %669 = vlog2.f32 %v383_v22  ;;  %v387_v26 = vadd.f32 1.0, %v386_v24  ;;  %vm390_vm1 = vcmp.lt.f32.partialorder %v389_v27, 0.0004427343 }
 0x16d   : > { %671 = vlog2.f32 %v374_v23  ;;  %v378_v28 = vadd.f32 1.0, %v377_v25  ;;  %vm381_vm3 = vcmp.lt.f32.partialorder %v380_v29, 0.0004427343 }
 0x16e   : > { %v388_v33 = vmul.f32 %v666_v20, %v387_v26 }
 0x16f   : > { %v379_v36 = vmul.f32 %v668_v21, %v378_v28 }
 0x176   : > { %v670_v30 = vpop.eup %669 }
 0x177   : > { %v672_v31 = vpop.eup %671  ;;  %v385_v32 = vmul.f32 0.6931472, %v670_v30 }
 0x178   : > { %v376_v35 = vmul.f32 0.6931472, %v672_v31 }
 0x179   : > { %v391_v37 = vsel %vm390_vm1, %v388_v33, %v385_v32 }
 0x17a   : > { %v393_v39 = vsub.f32 %v365_v34, %v391_v37  ;;  %v382_v40 = vsel %vm381_vm3, %v379_v36, %v376_v35 }
 0x17b   : > { %v392_v41 = vsub.f32 %v364_v38, %v382_v40 }
 0x17c   : > { %v397_v42 = vsel %vm395_vm2, %v393_v39, 0.0 }
 0x17d   : > { %v396_v43 = vsel %vm395_vm2, %v392_v41, 0.0 }
 0x17e   : > { %v398_v44 = vadd.f32 %v397_v42, %v396_v43 }
 0x180   : > { %v399_v45 = vrot.slane %v398_v44, 4 }
 0x182   : > { %v400_v46 = vadd.f32 %v399_v45, %v398_v44 }
 0x184   : > { %v401_v47 = vrot.slane %v400_v46, 2 }
 0x186   : > { %v402_v48 = vadd.f32 %v401_v47, %v400_v46 }
 0x188   : > { %v403_v49 = vrot.slane %v402_v48, 1 }
 0x18a   : > { %v404_v51 = vadd.f32 %v403_v49, %v402_v48 }
 0x18c   : > { %v405_v52 = vadd.f32 %v404_v51, %v394_v50 }
 0x18e   : > { %407 = vst.msk [vmem:[%s1143_s5] sm:$0x1] %vm406_vm4, %v405_v52 }
 0x18f   : > { %746 = shalt.err (!%p743_p9)
}
 0x190   : > { %s747_s13 = scalar_lea.hbm %s1153_s18, 16  ;;  %s751_s7 = scalar_lea.hbm %s1221_s4, 48 }
 0x191   : > { %p748_p2 = scmp.ne.s32.totalorder %s1153_s18, %s747_s13  ;;  %p752_p4 = scmp.lt.u32.totalorder %s1153_s18, %s1221_s4 }
 0x192   : > { %p753_p8 = scmp.lt.u32.totalorder %s751_s7, %s747_s13  ;;  %p755_p6 = scmp.lt.u32.totalorder %s747_s13, %s1153_s18 }
 0x193   : > { %p749_p11 = pnand %p748_p2, %p1251_p13 }
 0x194   : > { %p754_p10 = por %p753_p8, %p752_p4 }
 0x195   : > { %p750_p7 = pneg %p749_p11 }
 0x196   : > { %p756_p12 = por %p755_p6, %p754_p10 }
 0x198   : > { %p757_p0 = pnand %p756_p12, %p750_p7 }
 0x19a   : > { %760 = shalt.err (!%p757_p0)
}
 0x19b   : > { %559 = dma.vmem_to_hbm [thread:$0]  (%p1251_p13), %s1155_s12, 16, %s1153_s18, %s409_s15  }
 0x19c PF: > { %s1252_s28 = sld [smem:[#allocation13_spill]]  ;;  %p573_p5 = scmp.ge.s32.totalorder %s859_s27, 2 }
 0x19d   : > { %s433_s24 = sand.u32 1, %s831_s22  }
 0x19e   : > { %s434_s11 = scalar_lea.sflag [#allocation6], %s433_s24 }
 0x1a2   : > { %p1253_p3 = scmp.ne.s32.totalorder %s1252_s28, 0 }
 0x1a4   : > { %p569_p1 = pnand %p573_p5, %p1253_p3 }
 0x1a6   : > { %814 = dma.done.wait (!%p569_p1), %s434_s11, 16  }
 0x1a7   : > { %816 = vsyncadd (!%p569_p1), %s434_s11, 4294967280  ;;  %s25_s27 = sadd.s32 1, %s859_s27   ;;  %s1254_s9 = sld [smem:[#allocation14_spill]] }
 0x1a8   : > { %p22_p9 = scmp.ge.s32.totalorder %s25_s27, 11   ;;  %s1255_s19 = smov %s823_s20 }
 0x1a9   : > { %s1256_s20 = smov %s827_s21  ;;  %s1257_s21 = smov %s1070_s29 }
 0x1aa   : > { %s1258_s22 = smov %s835_s23  ;;  %s1259_s23 = smov %s839_s0 }
 0x1ab   : > { %s1260_s0 = smov %s1078_s14  ;;  %s1261_s24 = smov %s851_s25 }
 0x1ac   : > { %s1262_s1 = smov %s855_s26  ;;  %s1264_s26 = smov %s1270_s30 }
 0x1ad   : > { %s1263_s25 = smov %s1254_s9  ;;  %24 = sbr.rel (!%p22_p9) target bundleno = 15 (0xf), region = 98 }
 0x1b4   :  { %438 = vsyncpa [#allocation5], 1 }
 0x1b5   :  { %440 = vsyncpa [#allocation5 + $0x1], 1 }
 0x1b6   :  { %441 = vsyncpa [#allocation8], 1 }
 0x1b7   :  { %443 = vsyncpa [#allocation8 + $0x1], 1 }
 0x1b8   :  { %444 = vsyncpa [#allocation6], 1 }
 0x1b9   :  { %446 = vsyncpa [#allocation6 + $0x1], 1 }

</bundles_post_ra>
